<compile_context>
chip_gen: v7x
topology: tpu7x:2x2x1
jax: 0.10.0
libtpu: 0.0.40
codegen_flags: <defaults>
</compile_context>

<pallas_src>
import functools

import jax
import jax.numpy as jnp
from jax.experimental import pallas as pl
from jax.experimental.pallas import tpu as pltpu


def _ac_kernel(x_ref, w1_ref, b1_ref, w2_ref, b2_ref, o_ref, *,
               C, Ch, HW, resnet, inv_hw):
    # x_ref : (nb, C*HW)  VMEM block; row = one image, lanes = channel-major spatial
    # w1_ref: (Ch*C,)     SMEM, f32, w1[j, c] at index j*C + c
    # b1_ref: (Ch,)       SMEM, f32
    # w2_ref: (C*Ch,)     SMEM, f32, w2[c, j] at index c*Ch + j
    # b2_ref: (C,)        SMEM, f32
    # o_ref : (nb, C*HW)
    f32 = jnp.float32

    # --- squeeze: per-(image, channel) spatial mean, accumulated in f32 -------
    # Each channel slab is a static, lane-tile-aligned slice when HW % 128 == 0.
    means = []
    for c in range(C):
        sl = x_ref[:, c * HW:(c + 1) * HW]
        means.append(jnp.sum(sl.astype(f32), axis=-1, keepdims=True) * inv_hw)

    # --- excitation FC1 + ReLU: tiny broadcast-MACs with SMEM scalars ---------
    hs = []
    for j in range(Ch):
        acc = means[0] * w1_ref[j * C + 0]
        for c in range(1, C):
            acc = acc + means[c] * w1_ref[j * C + c]
        acc = acc + b1_ref[j]
        hs.append(jnp.maximum(acc, 0.0))                       # (nb, 1) f32

    # --- excitation FC2 + sigmoid, then scale each channel slab ---------------
    for c in range(C):
        acc = hs[0] * w2_ref[c * Ch + 0]
        for j in range(1, Ch):
            acc = acc + hs[j] * w2_ref[c * Ch + j]
        acc = acc + b2_ref[c]
        g = jax.nn.sigmoid(acc).astype(o_ref.dtype)            # (nb, 1), native dtype
        xs = x_ref[:, c * HW:(c + 1) * HW]                     # second ref read (no f32 copy kept)
        y = xs * g
        if resnet:
            y = y + xs
        o_ref[:, c * HW:(c + 1) * HW] = y


def ac_pallas(x_nchw, w1, b1, w2, b2, *, resnet=False):
    """x_nchw: (N, C, H, W). w1: (C//ratio, C), b1: (C//ratio,),
    w2: (C, C//ratio), b2: (C,). Returns (N, C, H, W)."""
    N, C, H, W = x_nchw.shape
    HW = H * W
    Ch = w1.shape[0]
    assert w1.shape == (Ch, C) and w2.shape == (C, Ch)
    assert b1.shape == (Ch,) and b2.shape == (C,)

    # Free contiguous reshape: one image per row, channel-major spatial on lanes.
    x2 = x_nchw.reshape(N, C * HW)

    # Tiny MLP params -> flat f32 arrays destined for SMEM.
    w1f = w1.astype(jnp.float32).reshape(Ch * C)
    b1f = b1.astype(jnp.float32).reshape(Ch)
    w2f = w2.astype(jnp.float32).reshape(C * Ch)
    b2f = b2.astype(jnp.float32).reshape(C)

    itemsize = jnp.dtype(x_nchw.dtype).itemsize
    row_bytes = C * HW * itemsize
    target = 8 << 20                                   # ~8 MiB of input per block
    nb = max(1, min(N, target // max(1, row_bytes)))
    if N > 8:
        if N >= 16:
            nb = min(nb, N // 2)                       # >=2 grid steps (v7x megacore)
        nb = max(8, (nb // 8) * 8)                     # sublane-dense blocks
        nb = min(nb, N)
    else:
        nb = N                                         # block == full batch dim
    grid = pl.cdiv(N, nb)                              # ragged tail block allowed

    block_bytes = nb * row_bytes
    vmem_limit = int(min(max(4 * block_bytes + (2 << 20), 16 << 20), 48 << 20))

    cost = pl.CostEstimate(
        flops=3 * N * C * HW,                          # reduce + scale (+ residual)
        transcendentals=N * C,                         # sigmoid
        bytes_accessed=2 * N * C * HW * itemsize)

    kernel = functools.partial(_ac_kernel, C=C, Ch=Ch, HW=HW,
                               resnet=resnet, inv_hw=1.0 / HW)

    out2 = pl.pallas_call(
        kernel,
        out_shape=jax.ShapeDtypeStruct((N, C * HW), x_nchw.dtype),
        grid_spec=pltpu.PrefetchScalarGridSpec(
            num_scalar_prefetch=0,
            grid=(grid,),
            in_specs=[
                pl.BlockSpec((nb, C * HW), lambda b: (b, 0)),
                pl.BlockSpec(memory_space=pltpu.MemorySpace.SMEM),
                pl.BlockSpec(memory_space=pltpu.MemorySpace.SMEM),
                pl.BlockSpec(memory_space=pltpu.MemorySpace.SMEM),
                pl.BlockSpec(memory_space=pltpu.MemorySpace.SMEM),
            ],
            out_specs=pl.BlockSpec((nb, C * HW), lambda b: (b, 0)),
        ),
        compiler_params=pltpu.CompilerParams(
            dimension_semantics=("parallel",),
            vmem_limit_bytes=vmem_limit),
        cost_estimate=cost,
    )(x2, w1f, b1f, w2f, b2f)

    return out2.reshape(N, C, H, W)


def ac_reference(x, w1, b1, w2, b2, *, resnet=False):
    """Pure-JAX reference matching the torch AC module."""
    m = jnp.mean(x, axis=(2, 3))                        # (N, C)
    h = jnp.maximum(m @ w1.T + b1, 0.0)                 # Linear + ReLU
    g = jax.nn.sigmoid(h @ w2.T + b2)                   # Linear + Sigmoid
    y = g[:, :, None, None] * x
    if resnet:
        y = y + x
    return y


if __name__ == "__main__":
    key = jax.random.PRNGKey(0)
    N, C, H, W = 2, 4, 16, 16
    ratio = 4
    Ch = int(C / ratio)                                 # hidden dim of the SE MLP

    k_x, k_w1, k_b1, k_w2, k_b2 = jax.random.split(key, 5)
    x = jax.random.normal(k_x, (N, C, H, W), dtype=jnp.float32)
    # Parameter shapes match torch Linear (out_features, in_features).
    w1 = jax.random.normal(k_w1, (Ch, C), dtype=jnp.float32) * 0.5
    b1 = jax.random.normal(k_b1, (Ch,), dtype=jnp.float32) * 0.1
    w2 = jax.random.normal(k_w2, (C, Ch), dtype=jnp.float32) * 0.5
    b2 = jax.random.normal(k_b2, (C,), dtype=jnp.float32) * 0.1

    # resnet=False (module default)
    out = jax.block_until_ready(ac_pallas(x, w1, b1, w2, b2, resnet=False))
    ref = jax.block_until_ready(ac_reference(x, w1, b1, w2, b2, resnet=False))
    assert out.shape == (N, C, H, W)
    assert jnp.allclose(out, ref, atol=1e-4, rtol=1e-4), "mismatch (resnet=False)"

    # resnet=True branch
    out_r = jax.block_until_ready(ac_pallas(x, w1, b1, w2, b2, resnet=True))
    ref_r = jax.block_until_ready(ac_reference(x, w1, b1, w2, b2, resnet=True))
    assert jnp.allclose(out_r, ref_r, atol=1e-4, rtol=1e-4), "mismatch (resnet=True)"

    print("KERNEL_OK")
</pallas_src>

<mosaic_0001>
module attributes {stable_mosaic.version = 11 : i64} {
  func.func @_ac_kernel(%arg0: i32, %arg1: memref<2x1024xf32, #tpu.memory_space<vmem>>, %arg2: memref<4xf32, #tpu.memory_space<smem>>, %arg3: memref<1xf32, #tpu.memory_space<smem>>, %arg4: memref<4xf32, #tpu.memory_space<smem>>, %arg5: memref<4xf32, #tpu.memory_space<smem>>, %arg6: memref<2x1024xf32, #tpu.memory_space<vmem>>) attributes {dimension_semantics = [#tpu.dimension_semantics<parallel>], iteration_bounds = array<i64: 1>, scalar_prefetch = 0 : i64, scratch_operands = 0 : i64, tpu.core_type = #tpu.core_type<tc>, window_params = [{transform_indices = @transform_0, window_bounds = array<i64: 2, 1024>}, {transform_indices = @transform_1, window_bounds = array<i64: 4>}, {transform_indices = @transform_2, window_bounds = array<i64: 1>}, {transform_indices = @transform_3, window_bounds = array<i64: 4>}, {transform_indices = @transform_4, window_bounds = array<i64: 4>}, {transform_indices = @transform_5, window_bounds = array<i64: 2, 1024>}]} {
    %c0 = arith.constant 0 : index
    %c0_0 = arith.constant 0 : index
    %0 = vector.load %arg1[%c0, %c0_0] : memref<2x1024xf32, #tpu.memory_space<vmem>>, vector<2x256xf32>
    %cst = arith.constant dense<0.000000e+00> : vector<2xf32>
    %1 = vector.multi_reduction <add>, %0, %cst [1] : vector<2x256xf32> to vector<2xf32>
    %2 = vector.shape_cast %1 : vector<2xf32> to vector<2x1xf32>
    %cst_1 = arith.constant 3.906250e-03 : f32
    %3 = vector.broadcast %cst_1 : f32 to vector<2x1xf32>
    %4 = arith.mulf %2, %3 : vector<2x1xf32>
    %c0_2 = arith.constant 0 : index
    %c256 = arith.constant 256 : index
    %5 = vector.load %arg1[%c0_2, %c256] : memref<2x1024xf32, #tpu.memory_space<vmem>>, vector<2x256xf32>
    %cst_3 = arith.constant dense<0.000000e+00> : vector<2xf32>
    %6 = vector.multi_reduction <add>, %5, %cst_3 [1] : vector<2x256xf32> to vector<2xf32>
    %7 = vector.shape_cast %6 : vector<2xf32> to vector<2x1xf32>
    %cst_4 = arith.constant 3.906250e-03 : f32
    %8 = vector.broadcast %cst_4 : f32 to vector<2x1xf32>
    %9 = arith.mulf %7, %8 : vector<2x1xf32>
    %c0_5 = arith.constant 0 : index
    %c512 = arith.constant 512 : index
    %10 = vector.load %arg1[%c0_5, %c512] : memref<2x1024xf32, #tpu.memory_space<vmem>>, vector<2x256xf32>
    %cst_6 = arith.constant dense<0.000000e+00> : vector<2xf32>
    %11 = vector.multi_reduction <add>, %10, %cst_6 [1] : vector<2x256xf32> to vector<2xf32>
    %12 = vector.shape_cast %11 : vector<2xf32> to vector<2x1xf32>
    %cst_7 = arith.constant 3.906250e-03 : f32
    %13 = vector.broadcast %cst_7 : f32 to vector<2x1xf32>
    %14 = arith.mulf %12, %13 : vector<2x1xf32>
    %c0_8 = arith.constant 0 : index
    %c768 = arith.constant 768 : index
    %15 = vector.load %arg1[%c0_8, %c768] : memref<2x1024xf32, #tpu.memory_space<vmem>>, vector<2x256xf32>
    %cst_9 = arith.constant dense<0.000000e+00> : vector<2xf32>
    %16 = vector.multi_reduction <add>, %15, %cst_9 [1] : vector<2x256xf32> to vector<2xf32>
    %17 = vector.shape_cast %16 : vector<2xf32> to vector<2x1xf32>
    %cst_10 = arith.constant 3.906250e-03 : f32
    %18 = vector.broadcast %cst_10 : f32 to vector<2x1xf32>
    %19 = arith.mulf %17, %18 : vector<2x1xf32>
    %c0_11 = arith.constant 0 : index
    %20 = memref.load %arg2[%c0_11] : memref<4xf32, #tpu.memory_space<smem>>
    %21 = vector.broadcast %20 : f32 to vector<2x1xf32>
    %22 = arith.mulf %4, %21 : vector<2x1xf32>
    %c1 = arith.constant 1 : index
    %23 = memref.load %arg2[%c1] : memref<4xf32, #tpu.memory_space<smem>>
    %24 = vector.broadcast %23 : f32 to vector<2x1xf32>
    %25 = arith.mulf %9, %24 : vector<2x1xf32>
    %26 = arith.addf %22, %25 : vector<2x1xf32>
    %c2 = arith.constant 2 : index
    %27 = memref.load %arg2[%c2] : memref<4xf32, #tpu.memory_space<smem>>
    %28 = vector.broadcast %27 : f32 to vector<2x1xf32>
    %29 = arith.mulf %14, %28 : vector<2x1xf32>
    %30 = arith.addf %26, %29 : vector<2x1xf32>
    %c3 = arith.constant 3 : index
    %31 = memref.load %arg2[%c3] : memref<4xf32, #tpu.memory_space<smem>>
    %32 = vector.broadcast %31 : f32 to vector<2x1xf32>
    %33 = arith.mulf %19, %32 : vector<2x1xf32>
    %34 = arith.addf %30, %33 : vector<2x1xf32>
    %c0_12 = arith.constant 0 : index
    %35 = memref.load %arg3[%c0_12] : memref<1xf32, #tpu.memory_space<smem>>
    %36 = vector.broadcast %35 : f32 to vector<2x1xf32>
    %37 = arith.addf %34, %36 : vector<2x1xf32>
    %cst_13 = arith.constant 0.000000e+00 : f32
    %38 = vector.broadcast %cst_13 : f32 to vector<2x1xf32>
    %39 = arith.maximumf %37, %38 : vector<2x1xf32>
    %c0_14 = arith.constant 0 : index
    %40 = memref.load %arg4[%c0_14] : memref<4xf32, #tpu.memory_space<smem>>
    %41 = vector.broadcast %40 : f32 to vector<2x1xf32>
    %42 = arith.mulf %39, %41 : vector<2x1xf32>
    %c0_15 = arith.constant 0 : index
    %43 = memref.load %arg5[%c0_15] : memref<4xf32, #tpu.memory_space<smem>>
    %44 = vector.broadcast %43 : f32 to vector<2x1xf32>
    %45 = arith.addf %42, %44 : vector<2x1xf32>
    %46 = arith.negf %45 : vector<2x1xf32>
    %47 = math.exp %46 : vector<2x1xf32>
    %cst_16 = arith.constant 1.000000e+00 : f32
    %48 = vector.broadcast %cst_16 : f32 to vector<2x1xf32>
    %49 = arith.addf %48, %47 : vector<2x1xf32>
    %50 = arith.divf %48, %49 : vector<2x1xf32>
    %c0_17 = arith.constant 0 : index
    %c0_18 = arith.constant 0 : index
    %51 = vector.load %arg1[%c0_17, %c0_18] : memref<2x1024xf32, #tpu.memory_space<vmem>>, vector<2x256xf32>
    %52 = vector.broadcast %50 : vector<2x1xf32> to vector<2x256xf32>
    %53 = arith.mulf %51, %52 : vector<2x256xf32>
    %c0_19 = arith.constant 0 : index
    %c0_20 = arith.constant 0 : index
    %54 = vector.load %arg6[%c0_19, %c0_20] : memref<2x1024xf32, #tpu.memory_space<vmem>>, vector<2x256xf32>
    tpu.vector_store %arg6[%c0_19, %c0_20], %53 {strides = array<i32>} : memref<2x1024xf32, #tpu.memory_space<vmem>>, vector<2x256xf32>,
    %c1_21 = arith.constant 1 : index
    %55 = memref.load %arg4[%c1_21] : memref<4xf32, #tpu.memory_space<smem>>
    %56 = vector.broadcast %55 : f32 to vector<2x1xf32>
    %57 = arith.mulf %39, %56 : vector<2x1xf32>
    %c1_22 = arith.constant 1 : index
    %58 = memref.load %arg5[%c1_22] : memref<4xf32, #tpu.memory_space<smem>>
    %59 = vector.broadcast %58 : f32 to vector<2x1xf32>
    %60 = arith.addf %57, %59 : vector<2x1xf32>
    %61 = arith.negf %60 : vector<2x1xf32>
    %62 = math.exp %61 : vector<2x1xf32>
    %cst_23 = arith.constant 1.000000e+00 : f32
    %63 = vector.broadcast %cst_23 : f32 to vector<2x1xf32>
    %64 = arith.addf %63, %62 : vector<2x1xf32>
    %65 = arith.divf %63, %64 : vector<2x1xf32>
    %c0_24 = arith.constant 0 : index
    %c256_25 = arith.constant 256 : index
    %66 = vector.load %arg1[%c0_24, %c256_25] : memref<2x1024xf32, #tpu.memory_space<vmem>>, vector<2x256xf32>
    %67 = vector.broadcast %65 : vector<2x1xf32> to vector<2x256xf32>
    %68 = arith.mulf %66, %67 : vector<2x256xf32>
    %c0_26 = arith.constant 0 : index
    %c256_27 = arith.constant 256 : index
    %69 = vector.load %arg6[%c0_26, %c256_27] : memref<2x1024xf32, #tpu.memory_space<vmem>>, vector<2x256xf32>
    tpu.vector_store %arg6[%c0_26, %c256_27], %68 {strides = array<i32>} : memref<2x1024xf32, #tpu.memory_space<vmem>>, vector<2x256xf32>,
    %c2_28 = arith.constant 2 : index
    %70 = memref.load %arg4[%c2_28] : memref<4xf32, #tpu.memory_space<smem>>
    %71 = vector.broadcast %70 : f32 to vector<2x1xf32>
    %72 = arith.mulf %39, %71 : vector<2x1xf32>
    %c2_29 = arith.constant 2 : index
    %73 = memref.load %arg5[%c2_29] : memref<4xf32, #tpu.memory_space<smem>>
    %74 = vector.broadcast %73 : f32 to vector<2x1xf32>
    %75 = arith.addf %72, %74 : vector<2x1xf32>
    %76 = arith.negf %75 : vector<2x1xf32>
    %77 = math.exp %76 : vector<2x1xf32>
    %cst_30 = arith.constant 1.000000e+00 : f32
    %78 = vector.broadcast %cst_30 : f32 to vector<2x1xf32>
    %79 = arith.addf %78, %77 : vector<2x1xf32>
    %80 = arith.divf %78, %79 : vector<2x1xf32>
    %c0_31 = arith.constant 0 : index
    %c512_32 = arith.constant 512 : index
    %81 = vector.load %arg1[%c0_31, %c512_32] : memref<2x1024xf32, #tpu.memory_space<vmem>>, vector<2x256xf32>
    %82 = vector.broadcast %80 : vector<2x1xf32> to vector<2x256xf32>
    %83 = arith.mulf %81, %82 : vector<2x256xf32>
    %c0_33 = arith.constant 0 : index
    %c512_34 = arith.constant 512 : index
    %84 = vector.load %arg6[%c0_33, %c512_34] : memref<2x1024xf32, #tpu.memory_space<vmem>>, vector<2x256xf32>
    tpu.vector_store %arg6[%c0_33, %c512_34], %83 {strides = array<i32>} : memref<2x1024xf32, #tpu.memory_space<vmem>>, vector<2x256xf32>,
    %c3_35 = arith.constant 3 : index
    %85 = memref.load %arg4[%c3_35] : memref<4xf32, #tpu.memory_space<smem>>
    %86 = vector.broadcast %85 : f32 to vector<2x1xf32>
    %87 = arith.mulf %39, %86 : vector<2x1xf32>
    %c3_36 = arith.constant 3 : index
    %88 = memref.load %arg5[%c3_36] : memref<4xf32, #tpu.memory_space<smem>>
    %89 = vector.broadcast %88 : f32 to vector<2x1xf32>
    %90 = arith.addf %87, %89 : vector<2x1xf32>
    %91 = arith.negf %90 : vector<2x1xf32>
    %92 = math.exp %91 : vector<2x1xf32>
    %cst_37 = arith.constant 1.000000e+00 : f32
    %93 = vector.broadcast %cst_37 : f32 to vector<2x1xf32>
    %94 = arith.addf %93, %92 : vector<2x1xf32>
    %95 = arith.divf %93, %94 : vector<2x1xf32>
    %c0_38 = arith.constant 0 : index
    %c768_39 = arith.constant 768 : index
    %96 = vector.load %arg1[%c0_38, %c768_39] : memref<2x1024xf32, #tpu.memory_space<vmem>>, vector<2x256xf32>
    %97 = vector.broadcast %95 : vector<2x1xf32> to vector<2x256xf32>
    %98 = arith.mulf %96, %97 : vector<2x256xf32>
    %c0_40 = arith.constant 0 : index
    %c768_41 = arith.constant 768 : index
    %99 = vector.load %arg6[%c0_40, %c768_41] : memref<2x1024xf32, #tpu.memory_space<vmem>>, vector<2x256xf32>
    tpu.vector_store %arg6[%c0_40, %c768_41], %98 {strides = array<i32>} : memref<2x1024xf32, #tpu.memory_space<vmem>>, vector<2x256xf32>,
    return
  }
  func.func @transform_0(%arg0: i32) -> (i32, i32) {
    %c0_i32 = arith.constant 0 : i32
    %c0_i32_0 = arith.constant 0 : i32
    return %arg0, %c0_i32 : i32, i32
  }
  func.func @transform_1(%arg0: i32) -> i32 {
    %c0_i32 = arith.constant 0 : i32
    %c0_i32_0 = arith.constant 0 : i32
    return %c0_i32 : i32
  }
  func.func @transform_2(%arg0: i32) -> i32 {
    %c0_i32 = arith.constant 0 : i32
    %c0_i32_0 = arith.constant 0 : i32
    return %c0_i32 : i32
  }
  func.func @transform_3(%arg0: i32) -> i32 {
    %c0_i32 = arith.constant 0 : i32
    %c0_i32_0 = arith.constant 0 : i32
    return %c0_i32 : i32
  }
  func.func @transform_4(%arg0: i32) -> i32 {
    %c0_i32 = arith.constant 0 : i32
    %c0_i32_0 = arith.constant 0 : i32
    return %c0_i32 : i32
  }
  func.func @transform_5(%arg0: i32) -> (i32, i32) {
    %c0_i32 = arith.constant 0 : i32
    %c0_i32_0 = arith.constant 0 : i32
    return %arg0, %c0_i32 : i32, i32
  }
}

</mosaic_0001>

<bundles_post_ra>
// kernel: tpu_custom_call.1
= control target key start
LH: loop header
LB: loop body
LE: loop exit
PB: predicated region body
PF: predicated region fallthrough
CT: control target
= control target key end

     0   :  { %11 = vsyncpa [#allocation4], 0  ;;  %s490_s0 = inlined_call_operand.hbm [shape: f32[2,1024], index: 0, kind: input, shape index: {}]   ;;  %s491_s1 = inlined_call_operand.vmem [shape: f32[4], index: 1, kind: input, shape index: {}]   ;;  %s492_s2 = inlined_call_operand.<no memory space> [shape: f32[1], index: 2, kind: input, shape index: {}]   ;;  %s493_s3 = inlined_call_operand.vmem [shape: f32[4], index: 3, kind: input, shape index: {}]   ;;  %s494_s4 = inlined_call_operand.vmem [shape: f32[4], index: 4, kind: input, shape index: {}]   ;;  %s495_s5 = inlined_call_operand.hbm [shape: f32[2,1024], index: 5, kind: output, shape index: {}]  }
   0x1   :  { %12 = vsyncpa [#allocation6], 0 }
   0x2   :  { %13 = vsyncpa [#allocation9], 0  ;;  %s43_s20 = sshll.u32 %s493_s3, 4  ;;  %s44_s20 = int_to_ptr.vmem [resolvable:$true] %s43_s20 }
   0x3   :  { %14 = vsyncpa [#allocation5], 0  ;;  %s313_s21 = scalar_lea.vmem %s44_s20, 16  ;;  %p318_p1 = scmp.lt.s32.totalorder %s44_s20, %s44_s20 }
   0x4   :  { %p314_p0 = scmp.ne.s32.totalorder %s44_s20, %s313_s21  ;;  %p319_p2 = scmp.lt.s32.totalorder %s313_s21, %s313_s21 }
   0x6   :  { %p320_p3 = por %p319_p2, %p318_p1 }
   0x8   :  { %p321_p4 = pnand %p320_p3, %p314_p0 }
   0xa   :  { %324 = shalt.err (!%p321_p4)
}
   0xb   :  { %s401_s22 = smov [#allocation8]   ;;  %s402_s23 = smov [#allocation3]  }
   0xc   :  { %46 = dma.vmem_to_smem %s44_s20, 16, %s401_s22, [#allocation9]  }
   0xd   :  { %s21_s24 = sshll.u32 %s402_s23, 4  ;;  %s31_s27 = sshll.u32 %s491_s1, 4  ;;  %s22_s24 = int_to_ptr.vmem [resolvable:$true] %s21_s24  ;;  %s32_s27 = int_to_ptr.vmem [resolvable:$true] %s31_s27 }
   0xe   :  { %s325_s29 = scalar_lea.hbm %s490_s0, 256 }
   0xf   :  { %p326_p5 = scmp.ne.s32.totalorder %s490_s0, %s325_s29  ;;  %p329_p6 = scmp.lt.u32.totalorder %s325_s29, %s490_s0 }
  0x11   :  { %p331_p7 = pnand %p329_p6, %p326_p5 }
  0x13   :  { %334 = shalt.err (!%p331_p7)
}
  0x14   :  { %s335_s9 = scalar_lea.vmem %s22_s24, 256  ;;  %p340_p9 = scmp.lt.s32.totalorder %s22_s24, %s22_s24 }
  0x15   :  { %p336_p8 = scmp.ne.s32.totalorder %s22_s24, %s335_s9  ;;  %p341_p10 = scmp.lt.s32.totalorder %s335_s9, %s335_s9 }
  0x17   :  { %p342_p11 = por %p341_p10, %p340_p9 }
  0x19   :  { %p343_p12 = pnand %p342_p11, %p336_p8 }
  0x1b   :  { %346 = shalt.err (!%p343_p12)
}
  0x1c   :  { %24 = dma.hbm_to_vmem [thread:$0]  %s490_s0, 256, %s22_s24, [#allocation4]  }
  0x1d   :  { %s53_s13 = sshll.u32 %s494_s4, 4  ;;  %s347_s14 = scalar_lea.vmem %s32_s27, 16  ;;  %s54_s13 = int_to_ptr.vmem [resolvable:$true] %s53_s13 }
  0x1e   :  { %p348_p13 = scmp.ne.s32.totalorder %s32_s27, %s347_s14  ;;  %p352_p0 = scmp.lt.s32.totalorder %s32_s27, %s32_s27 }
  0x1f   :  { %p353_p1 = scmp.lt.s32.totalorder %s347_s14, %s347_s14 }
  0x21   :  { %p354_p2 = por %p353_p1, %p352_p0 }
  0x23   :  { %p355_p3 = pnand %p354_p2, %p348_p13 }
  0x25   :  { %358 = shalt.err (!%p355_p3)
}
  0x26   :  { %s403_s15 = smov [#allocation7]   ;;  %s359_s16 = scalar_lea.vmem %s54_s13, 16 }
  0x27   :  { %34 = dma.vmem_to_smem %s32_s27, 16, %s403_s15, [#allocation6]  }
  0x28   :  { %p360_p4 = scmp.ne.s32.totalorder %s54_s13, %s359_s16  ;;  %p364_p5 = scmp.lt.s32.totalorder %s54_s13, %s54_s13 }
  0x29   :  { %p365_p6 = scmp.lt.s32.totalorder %s359_s16, %s359_s16 }
  0x2b   :  { %p366_p7 = por %p365_p6, %p364_p5 }
  0x2d   :  { %p367_p8 = pnand %p366_p7, %p360_p4 }
  0x2f   :  { %370 = shalt.err (!%p367_p8)
}
  0x30   :  { %s404_s0 = smov [#allocation10]  }
  0x31   :  { %56 = dma.vmem_to_smem %s54_s13, 16, %s404_s0, [#allocation9]  }
  0x32   :  { %393 = dma.done.wait [#allocation4], 256  }
  0x33   :  { %394 = vsyncadd [#allocation4], 4294967040 }
  0x34   :  { %395 = dma.done.wait [#allocation6], 16  }
  0x35   :  { %396 = vsyncadd [#allocation6], 4294967280 }
  0x36   :  { %397 = dma.done.wait [#allocation9], 32  }
  0x37   :  { %398 = vsyncadd [#allocation9], 4294967264 }
  0x38   :  { %69 = sfence }
  0x39   :  { %v75_v0 = vlaneseq  ;;  %v405_v1 = vmov 1983009808   ;;  %vm82_vm0 = vcmask 1041408   ;;  %v462_v7 = vld [vmem:[#allocation3] sm:$0xf]  ;;  %s143_s4 = sld [smem:[#allocation7]]  ;;  %v159_v45 = vstv %s492_s2 }
  0x3a   :  { %v73_v2 = vunpack.c.l.s4 %v405_v1  ;;  %v275_v3 = vld.sshfl [vmem:[#allocation3 + $0x8] sm:$0x33 pattern:$0x76325410]  ;;  %s277_s17 = sld [smem:[#allocation7 + $0x1]]  ;;  %s278_s18 = sld [smem:[#allocation7 + $0x2]] }
  0x3b   :  { %v459_v4 = vshrl.u32 %v75_v0, 7  ;;  %v116_v5 = vcombine.high %v275_v3, %v275_v3  ;;  %v119_v6 = vsel %vm82_vm0, %v275_v3, 0.0  ;;  %v276_v9 = vld.sshfl [vmem:[#allocation3 + $0xc] sm:$0x33 pattern:$0x76325410] }
  0x3c   :  { %v74_v8 = vunpack.c.0.s8 %v73_v2  ;;  %v274_v11 = vld.sshfl [vmem:[#allocation3 + $0x4] sm:$0x33 pattern:$0x76325410]  ;;  %v134_v12 = vcombine.high %v276_v9, %v276_v9  ;;  %v137_v13 = vsel %vm82_vm0, %v276_v9, 0.0  ;;  %s279_s19 = sld [smem:[#allocation7 + $0x3]] }
  0x3d   :  { %v120_v10 = vsel %vm82_vm0, %v116_v5, 0.0  ;;  %v98_v18 = vcombine.high %v274_v11, %v274_v11  ;;  %v101_v23 = vsel %vm82_vm0, %v274_v11, 0.0  ;;  %s162_s20 = sld [smem:[#allocation8]]  ;;  %s281_s21 = sld [smem:[#allocation8 + $0x1]]  ;;  %v406_v11 = vmov 269488144  }
  0x3e   :  { %v77_v14 = vsub.s32 %v74_v8, %v459_v4  ;;  %v121_v15 = vadd.f32 %v120_v10, %v119_v6  ;;  %v138_v16 = vsel %vm82_vm0, %v134_v12, 0.0  ;;  %s284_s22 = sld [smem:[#allocation8 + $0x2]]  ;;  %s287_s23 = sld [smem:[#allocation8 + $0x3]]  ;;  %v176_v12 = vunpack.c.l.s4 %v406_v11 }
  0x3f   :  { %v139_v19 = vadd.f32 %v138_v16, %v137_v13  ;;  %v102_v24 = vsel %vm82_vm0, %v98_v18, 0.0  ;;  %v144_v31 = vstv %s143_s4  ;;  %s165_s24 = sld [smem:[#allocation10]]  ;;  %s282_s25 = sld [smem:[#allocation10 + $0x1]] }
  0x40   :  { %v78_v17 = vrot.slane %v462_v7, %v77_v14  ;;  %122 = vadd.xlane.f32.xlu1 %v121_v15  ;;  %v103_v26 = vadd.f32 %v102_v24, %v101_v23  ;;  %v147_v32 = vstv %s277_s17  ;;  %v151_v37 = vstv %s278_s18  ;;  %s285_s26 = sld [smem:[#allocation10 + $0x2]]  ;;  %s288_s27 = sld [smem:[#allocation10 + $0x3]] }
  0x41   :  { %s407_s2 = smov [#allocation11]  }
  0x42   :  { %v79_v20 = vcombine.high %v78_v17, %v78_v17  ;;  %v83_v21 = vsel %vm82_vm0, %v78_v17, 0.0  ;;  %v155_v38 = vstv %s279_s19  ;;  %v177_v17 = vunpack.c.0.s8 %v176_v12  ;;  %s263_s29 = sshll.u32 %s407_s2, 4  ;;  %s264_s29 = int_to_ptr.vmem [resolvable:$true] %s263_s29 }
  0x43   :  { %v163_v48 = vstv %s162_s20  ;;  %v186_v49 = vstv %s281_s21  ;;  %s371_s30 = scalar_lea.vmem %s264_s29, 256  ;;  %p376_p10 = scmp.lt.s32.totalorder %s264_s29, %s264_s29 }
  0x44   :  { %v84_v22 = vsel %vm82_vm0, %v79_v20, 0.0  ;;  %140 = vadd.xlane.f32.xlu1 %v139_v19  ;;  %v210_v50 = vstv %s284_s22  ;;  %v234_v51 = vstv %s287_s23  ;;  %v180_v18 = vsub.s32 %v177_v17, %v459_v4  ;;  %p372_p9 = scmp.ne.s32.totalorder %s264_s29, %s371_s30  ;;  %p377_p11 = scmp.lt.s32.totalorder %s371_s30, %s371_s30 }
  0x45   :  { %v85_v25 = vadd.f32 %v84_v22, %v83_v21  ;;  %v166_v53 = vstv %s165_s24  ;;  %v189_v54 = vstv %s282_s25  ;;  %v197_v22 = vld [vmem:[#allocation3 + $0x4] sm:$0xf] }
  0x46   :  { %v213_v55 = vstv %s285_s26  ;;  %v237_v56 = vstv %s288_s27  ;;  %p378_p12 = por %p377_p11, %p376_p10 }
  0x47   :  { %86 = vadd.xlane.f32.xlu0 %v85_v25  ;;  %v221_v25 = vld [vmem:[#allocation3 + $0x8] sm:$0xf] }
  0x48   :  { %p379_p13 = pnand %p378_p12, %p372_p9 }
  0x4b   :  { %104 = vadd.xlane.f32.xlu0 %v103_v26 }
  0xcd   :  { %v123_v27 = vpop.xlane.xlu1 %122 }
  0xce   :  { %v124_v34 = vmul.f32 0.00390625, %v123_v27 }
  0xd0   :  { %v152_v41 = vmul.f32 %v151_v37, %v124_v34 }
  0xd1   :  { %v141_v29 = vpop.xlane.xlu1 %140 }
  0xd2   :  { %v142_v36 = vmul.f32 0.00390625, %v141_v29  ;;  %v245_v29 = vld [vmem:[#allocation3 + $0xc] sm:$0xf] }
  0xd4   :  { %v87_v28 = vpop.xlane.xlu0 %86  ;;  %v156_v43 = vmul.f32 %v155_v38, %v142_v36 }
  0xd5   :  { %v88_v30 = vmul.f32 0.00390625, %v87_v28 }
  0xd7   :  { %v145_v39 = vmul.f32 %v144_v31, %v88_v30 }
  0xd8   :  { %v105_v33 = vpop.xlane.xlu0 %104 }
  0xd9   :  { %v106_v35 = vmul.f32 0.00390625, %v105_v33 }
  0xdb   :  { %v148_v40 = vmul.f32 %v147_v32, %v106_v35 }
  0xdd   :  { %v149_v42 = vadd.f32 %v148_v40, %v145_v39 }
  0xdf   :  { %v153_v44 = vadd.f32 %v152_v41, %v149_v42 }
  0xe1   :  { %v157_v46 = vadd.f32 %v156_v43, %v153_v44 }
  0xe3   :  { %v160_v47 = vadd.f32 %v159_v45, %v157_v46 }
  0xe5   :  { %v161_v52 = vmax.f32 %v160_v47, 0.0 }
  0xe7   :  { %v164_v57 = vmul.f32 %v163_v48, %v161_v52  ;;  %v187_v58 = vmul.f32 %v186_v49, %v161_v52  ;;  %v211_v59 = vmul.f32 %v210_v50, %v161_v52  ;;  %v235_v60 = vmul.f32 %v234_v51, %v161_v52 }
  0xe9   :  { %v167_v61 = vadd.f32 %v166_v53, %v164_v57  ;;  %v190_v62 = vadd.f32 %v189_v54, %v187_v58  ;;  %v214_v63 = vadd.f32 %v213_v55, %v211_v59  ;;  %v238_v0 = vadd.f32 %v237_v56, %v235_v60 }
  0xeb   :  { %v280_v1 = vmul.f32 -1.442695, %v167_v61  ;;  %v283_v2 = vmul.f32 -1.442695, %v190_v62  ;;  %v286_v3 = vmul.f32 -1.442695, %v214_v63 }
  0xec   :  { %v289_v5 = vmul.f32 -1.442695, %v238_v0 }
  0xed   :  { %297 = vpow2.f32 %v280_v1 }
  0xee   :  { %299 = vpow2.f32 %v283_v2 }
  0xef   :  { %301 = vpow2.f32 %v286_v3 }
  0xf0   :  { %303 = vpow2.f32 %v289_v5 }
  0xf7   :  { %v298_v6 = vpop.eup %297 }
  0xf8   :  { %v300_v8 = vpop.eup %299  ;;  %v171_v9 = vadd.f32 1.0, %v298_v6 }
  0xf9   :  { %v302_v10 = vpop.eup %301  ;;  %v194_v13 = vadd.f32 1.0, %v300_v8 }
  0xfa   :  { %v304_v14 = vpop.eup %303  ;;  %305 = vrcp.f32 %v171_v9  ;;  %v218_v15 = vadd.f32 1.0, %v302_v10 }
  0xfb   :  { %307 = vrcp.f32 %v194_v13  ;;  %v242_v16 = vadd.f32 1.0, %v304_v14 }
  0xfc   :  { %309 = vrcp.f32 %v218_v15 }
  0xfd   :  { %311 = vrcp.f32 %v242_v16 }
 0x104   :  { %v306_v19 = vpop.eup %305 }
 0x105   :  { %v308_v20 = vpop.eup %307  ;;  %v181_v21 = vrot.slane %v306_v19, %v180_v18 }
 0x106   :  { %v310_v23 = vpop.eup %309  ;;  %v205_v24 = vrot.slane %v308_v20, %v180_v18 }
 0x107   :  { %v312_v26 = vpop.eup %311  ;;  %v183_v27 = vmul.f32 %v181_v21, %v462_v7  ;;  %v229_v28 = vrot.slane %v310_v23, %v180_v18 }
 0x108   :  { %v207_v30 = vmul.f32 %v205_v24, %v197_v22  ;;  %v253_v31 = vrot.slane %v312_v26, %v180_v18 }
 0x109   :  { %184 = vst [vmem:[#allocation11] sm:$0xf] %v183_v27  ;;  %v231_v32 = vmul.f32 %v229_v28, %v221_v25 }
 0x10a   :  { %208 = vst [vmem:[#allocation11 + $0x4] sm:$0xf] %v207_v30  ;;  %v255_v4 = vmul.f32 %v253_v31, %v245_v29 }
 0x10b   :  { %232 = vst [vmem:[#allocation11 + $0x8] sm:$0xf] %v231_v32 }
 0x10c   :  { %256 = vst [vmem:[#allocation11 + $0xc] sm:$0xf] %v255_v4 }
 0x10d   :  { %382 = shalt.err (!%p379_p13)
}
 0x10e   :  { %s383_s8 = scalar_lea.hbm %s495_s5, 256 }
 0x10f   :  { %p384_p0 = scmp.ne.s32.totalorder %s495_s5, %s383_s8  ;;  %p387_p1 = scmp.lt.u32.totalorder %s383_s8, %s495_s5 }
 0x111   :  { %p389_p2 = pnand %p387_p1, %p384_p0 }
 0x113   :  { %392 = shalt.err (!%p389_p2)
}
 0x114   :  { %266 = dma.vmem_to_hbm [thread:$0]  %s264_s29, 256, %s495_s5, [#allocation5]  }
 0x115   :  { %399 = dma.done.wait [#allocation5], 256  }
 0x116   :  { %400 = vsyncadd [#allocation5], 4294967040 }
 0x117   :  { %270 = vsyncpa [#allocation4], 1 }
 0x118   :  { %271 = vsyncpa [#allocation5], 1 }
 0x119   :  { %272 = vsyncpa [#allocation6], 1 }
 0x11a   :  { %273 = vsyncpa [#allocation9], 1 }

</bundles_post_ra>
